<compile_context>
chip_gen: v6e
topology: v6e:2x2x1
jax: 0.10.0
libtpu: 0.0.40
codegen_flags: <defaults>
</compile_context>

<pallas_src>
import functools
import math

import jax
import jax.numpy as jnp
from jax.experimental import pallas as pl
from jax.experimental.pallas import tpu as pltpu


def _round_up(x, m):
    return -(-x // m) * m


def unit_conv2d_kernel(x_ref, w_ref, bias_ref, scale_ref, shift_ref, o_ref, *, K):
    """One grid step: K-tap temporal conv + bias + Mish + folded BN.

    x_ref    : (C_in, L)        zero-padded input block, L = TB*T_row lanes
    w_ref    : (K, C_out, C_in) conv weights (constant across the grid)
    bias_ref : (C_out, 1)       conv bias
    scale_ref: (C_out, 1)       folded BN scale = gamma * rsqrt(var + eps)
    shift_ref: (C_out, 1)       folded BN shift = beta - mean * scale
    o_ref    : (C_out, L)       lane-dense output block
    """
    x = x_ref[...]
    L = x.shape[-1]

    # acc[:, i] = bias + sum_k W_k @ x[:, i + k].
    # pltpu.roll is a cyclic lane rotation; wrapped lanes only land in the
    # discarded tail of the last row (guaranteed by T_row >= T + 2*pad).
    acc = jnp.dot(w_ref[0], x, preferred_element_type=jnp.float32) + bias_ref[...]
    for k in range(1, K):
        xk = pltpu.roll(x, shift=L - k, axis=1)        # out[:, i] = x[:, i + k]
        acc = acc + jnp.dot(w_ref[k], xk, preferred_element_type=jnp.float32)

    # Mish: y * tanh(softplus(y)) == y * e(e+2) / (e(e+2) + 2), e = exp(y).
    # One EUP transcendental per element; the clamp avoids exp overflow and the
    # where() restores the exact asymptote mish(y) ~ y for large y.
    y = acc
    e = jnp.exp(jnp.minimum(y, 20.0))
    t = e * (e + 2.0)
    mish = y * (t / (t + 2.0))
    mish = jnp.where(y > 20.0, y, mish)

    o_ref[...] = (mish * scale_ref[...] + shift_ref[...]).astype(o_ref.dtype)


def _block_vmem_bytes(c_in, c_out, L, in_bytes, K):
    """Rough per-block VMEM footprint (double-buffered in/out + weights + temps)."""
    x_buf = 2 * max(c_in, 8) * L * in_bytes
    o_buf = 2 * max(c_out, 8) * L * 4
    w_buf = 2 * K * max(c_out, 8) * max(c_in, 128) * in_bytes
    tmp = 4 * max(c_out, 8) * L * 4            # acc / rolled x / epilogue temps
    return x_buf + o_buf + w_buf + tmp


def _select_tiling(B, t_need, c_in, c_out, in_bytes, K, vmem_budget):
    """Pick (T_row, TB, B_pad, n_blocks) such that:
       - every block lane extent L = TB*T_row is a multiple of 128 (unmasked
         loads/stores, the biggest measured lever),
       - the double-buffered block fits the per-chip VMEM budget,
       - the grid has >= 4 parallel steps when the batch allows it
         (>= 2 pipelined steps per v7x TensorCore),
       - HBM padding waste is minimized."""
    best_key, best = None, None
    for align in (8, 16, 32, 64, 128):
        T_row = _round_up(t_need, align)
        g = 128 // math.gcd(T_row, 128)        # min rows/block for lane-dense L
        max_steps = _round_up(B, g) // g
        target_steps = min(4, max_steps)
        tb = g
        while True:
            cand = tb * 2
            if cand > _round_up(B, g):
                break
            if _round_up(B, cand) // cand < target_steps:
                break
            if _block_vmem_bytes(c_in, c_out, cand * T_row, in_bytes, K) > vmem_budget:
                break
            tb = cand
        B_pad = _round_up(B, tb)
        n_blocks = B_pad // tb
        waste = (B_pad * T_row) / float(max(B * t_need, 1))
        key = (min(n_blocks, 4), -waste, -n_blocks)
        if best_key is None or key > best_key:
            best_key, best = key, (T_row, tb, B_pad, n_blocks)
    return best


def unit_conv2d_forward(x_nchw, weight, bias, gamma, beta, running_mean,
                        running_var, *, stride=1, eps=1e-5,
                        use_bf16_matmul=False, out_dtype=jnp.float32):
    """x_nchw: (N, C_in, T, V); weight: (C_out, C_in, K, 1) -> (N, C_out, T_out, V).

    Matches UnitConv2D.forward in eval() mode (Dropout = identity, BN uses
    running statistics)."""
    N, C_in, T, V = x_nchw.shape
    C_out, _, K, _ = weight.shape
    pad = (K - 1) // 2
    B = N * V
    T_out = (T + 2 * pad - K) // stride + 1
    t_need = T + 2 * pad                        # temporal extent actually read

    in_dtype = jnp.bfloat16 if use_bf16_matmul else jnp.float32
    in_bytes = jnp.dtype(in_dtype).itemsize

    # ---- per-chip VMEM-aware tiling -----------------------------------------
    try:
        vmem_cap = int(pltpu.get_tpu_info().vmem_capacity_bytes)
    except Exception:
        vmem_cap = 64 << 20                     # v7x per-TensorCore floor
    T_row, TB, B_pad, n_blocks = _select_tiling(
        B, t_need, C_in, C_out, in_bytes, K, vmem_budget=vmem_cap // 3)
    L = TB * T_row
    block_bytes = _block_vmem_bytes(C_in, C_out, L, in_bytes, K)
    vmem_limit = int(min(int(vmem_cap * 0.85), max(32 << 20, 4 * block_bytes)))

    # ---- wrapper-side layout prep (no im2col: input bytes NOT duplicated) ----
    # NCHW -> (C_in, B, T); zero-pad rows to B_pad and time to [pad | T | rest].
    # TODO(synk): fold this relayout into the producer/consumer (or a BlockSpec
    # index_map) to avoid the extra HBM round trip at real GaitTR sizes.
    x = jnp.transpose(x_nchw, (1, 0, 3, 2)).reshape(C_in, B, T)
    x = jnp.pad(x, ((0, 0), (0, B_pad - B), (pad, T_row - T - pad)))
    x_slab = x.reshape(C_in, B_pad * T_row).astype(in_dtype)

    # (C_out, C_in, K, 1) -> (K, C_out, C_in).  The optional bf16 cast happens
    # here in HBM, so input DMA traffic is halved (not cast post-DMA in-kernel).
    w_taps = jnp.transpose(weight[:, :, :, 0], (2, 0, 1)).astype(in_dtype)

    # Fold inference BatchNorm into per-channel scale/shift (Mish sits between
    # conv and BN, so only the BN affine folds, not the conv weights).
    bn_scale = (gamma * jax.lax.rsqrt(running_var + eps)).astype(jnp.float32)
    bn_shift = (beta - running_mean * bn_scale).astype(jnp.float32)
    bias_col = bias.reshape(C_out, 1).astype(jnp.float32)
    scale_col = bn_scale.reshape(C_out, 1)
    shift_col = bn_shift.reshape(C_out, 1)

    cost = pl.CostEstimate(
        flops=2 * K * C_out * C_in * B_pad * T_row,
        transcendentals=C_out * B_pad * T_row,
        bytes_accessed=(x_slab.size * in_bytes + w_taps.size * in_bytes
                        + 3 * C_out * 4
                        + C_out * B_pad * T_row * jnp.dtype(out_dtype).itemsize),
    )

    kernel = functools.partial(unit_conv2d_kernel, K=K)
    out = pl.pallas_call(
        kernel,
        out_shape=jax.ShapeDtypeStruct((C_out, B_pad * T_row), out_dtype),
        grid_spec=pltpu.PrefetchScalarGridSpec(
            num_scalar_prefetch=0,
            grid=(n_blocks,),
            in_specs=[
                pl.BlockSpec((C_in, L), lambda i: (0, i)),            # x slab
                pl.BlockSpec((K, C_out, C_in), lambda i: (0, 0, 0)),  # weights
                pl.BlockSpec((C_out, 1), lambda i: (0, 0)),           # conv bias
                pl.BlockSpec((C_out, 1), lambda i: (0, 0)),           # BN scale
                pl.BlockSpec((C_out, 1), lambda i: (0, 0)),           # BN shift
            ],
            out_specs=pl.BlockSpec((C_out, L), lambda i: (0, i)),
        ),
        compiler_params=pltpu.CompilerParams(
            dimension_semantics=("parallel",),
            vmem_limit_bytes=vmem_limit),
        cost_estimate=cost,
    )(x_slab, w_taps, bias_col, scale_col, shift_col)

    # Strided conv == stride-1 conv subsampled; Mish/BN are elementwise, so the
    # kept positions are exact.  Drop padded rows and padded/garbage tail lanes.
    out = out.reshape(C_out, B_pad, T_row)[:, :B, :(T_out - 1) * stride + 1:stride]
    # TODO(synk): keep the (C_out, B, T_out) layout for the downstream TCN_ST
    # block to avoid this extra HBM round trip back to NCHW at real sizes.
    return jnp.transpose(out.reshape(C_out, N, V, T_out), (1, 0, 3, 2))


def _reference_forward(x_nchw, weight, bias, gamma, beta, mean, var,
                       *, stride=1, eps=1e-5):
    """Plain-JAX reference (conv + bias + mish + inference BN)."""
    K = weight.shape[2]
    pad = (K - 1) // 2
    y = jax.lax.conv_general_dilated(
        x_nchw.astype(jnp.float32), weight.astype(jnp.float32),
        window_strides=(stride, 1), padding=((pad, pad), (0, 0)),
        dimension_numbers=("NCHW", "OIHW", "NCHW"))
    y = y + bias.reshape(1, -1, 1, 1)
    y = y * jnp.tanh(jax.nn.softplus(y))
    inv = jax.lax.rsqrt(var + eps).reshape(1, -1, 1, 1)
    return (y - mean.reshape(1, -1, 1, 1)) * inv \
        * gamma.reshape(1, -1, 1, 1) + beta.reshape(1, -1, 1, 1)


if __name__ == "__main__":
    # Small shapes consistent with UnitConv2D on an (N, C, T, V) skeleton tensor.
    N, D_in, T, V = 2, 4, 16, 16
    D_out, K = 8, 9
    dropout_p = 0.1  # inference mode -> identity (not applied)

    key = jax.random.PRNGKey(0)
    k_x, k_w, k_b, k_g, k_be, k_m, k_v = jax.random.split(key, 7)

    x = jax.random.normal(k_x, (N, D_in, T, V), dtype=jnp.float32)

    # conv_init: weight ~ Normal(0, sqrt(2 / (D_out * K * 1)))
    n = D_out * K * 1
    weight = jax.random.normal(k_w, (D_out, D_in, K, 1), dtype=jnp.float32) \
        * math.sqrt(2.0 / n)
    # conv bias: PyTorch default uniform(-1/sqrt(fan_in), 1/sqrt(fan_in))
    fan_in = D_in * K * 1
    bound = 1.0 / math.sqrt(fan_in)
    bias = jax.random.uniform(k_b, (D_out,), minval=-bound, maxval=bound,
                              dtype=jnp.float32)

    # BatchNorm2d parameters / running stats (deterministic, non-trivial).
    gamma = 1.0 + 0.1 * jax.random.normal(k_g, (D_out,), dtype=jnp.float32)
    beta = 0.1 * jax.random.normal(k_be, (D_out,), dtype=jnp.float32)
    running_mean = 0.1 * jax.random.normal(k_m, (D_out,), dtype=jnp.float32)
    running_var = 1.0 + 0.1 * jax.random.uniform(k_v, (D_out,),
                                                 dtype=jnp.float32)

    # TODO(synk): training-mode Dropout / batch-statistics BatchNorm not
    # implemented (forward matches module.eval() semantics).

    for stride in (1, 2):
        out = unit_conv2d_forward(x, weight, bias, gamma, beta, running_mean,
                                  running_var, stride=stride,
                                  use_bf16_matmul=False)
        out = jax.block_until_ready(out)
        ref = _reference_forward(x, weight, bias, gamma, beta, running_mean,
                                 running_var, stride=stride)
        assert out.shape == ref.shape, (out.shape, ref.shape)
        assert jnp.allclose(out, ref, atol=1e-4, rtol=1e-4), \
            float(jnp.max(jnp.abs(out - ref)))

    print("KERNEL_OK")
</pallas_src>

<mosaic_0001>
module attributes {stable_mosaic.version = 11 : i64} {
  func.func @unit_conv2d_kernel(%arg0: i32, %arg1: memref<4x256xf32, #tpu.memory_space<vmem>>, %arg2: memref<9x8x4xf32, #tpu.memory_space<vmem>>, %arg3: memref<8x1xf32, #tpu.memory_space<vmem>>, %arg4: memref<8x1xf32, #tpu.memory_space<vmem>>, %arg5: memref<8x1xf32, #tpu.memory_space<vmem>>, %arg6: memref<8x256xf32, #tpu.memory_space<vmem>>) attributes {dimension_semantics = [#tpu.dimension_semantics<parallel>], iteration_bounds = array<i64: 4>, scalar_prefetch = 0 : i64, scratch_operands = 0 : i64, tpu.core_type = #tpu.core_type<tc>, window_params = [{transform_indices = @transform_0, window_bounds = array<i64: 4, 256>}, {pipeline_mode = #tpu.pipeline_mode<synchronous>, transform_indices = @transform_1, window_bounds = array<i64: 9, 8, 4>}, {pipeline_mode = #tpu.pipeline_mode<synchronous>, transform_indices = @transform_2, window_bounds = array<i64: 8, 1>}, {pipeline_mode = #tpu.pipeline_mode<synchronous>, transform_indices = @transform_3, window_bounds = array<i64: 8, 1>}, {pipeline_mode = #tpu.pipeline_mode<synchronous>, transform_indices = @transform_4, window_bounds = array<i64: 8, 1>}, {transform_indices = @transform_5, window_bounds = array<i64: 8, 256>}]} {
    %c0 = arith.constant 0 : index
    %c0_0 = arith.constant 0 : index
    %0 = vector.load %arg1[%c0, %c0_0] : memref<4x256xf32, #tpu.memory_space<vmem>>, vector<4x256xf32>
    %c0_1 = arith.constant 0 : index
    %c0_2 = arith.constant 0 : index
    %c0_3 = arith.constant 0 : index
    %1 = vector.load %arg2[%c0_1, %c0_2, %c0_3] : memref<9x8x4xf32, #tpu.memory_space<vmem>>, vector<1x8x4xf32>
    %2 = vector.shape_cast %1 : vector<1x8x4xf32> to vector<8x4xf32>
    %cst = arith.constant dense<0.000000e+00> : vector<8x256xf32>
    %3 = tpu.matmul %2, %0, %cst {dimension_numbers = #tpu.dot_dimension_numbers<[1], [0], [0], [1], [0, 0, 1, 1], [], []>} : vector<8x4xf32>, vector<4x256xf32>, vector<8x256xf32> -> vector<8x256xf32>
    %c0_4 = arith.constant 0 : index
    %c0_5 = arith.constant 0 : index
    %4 = vector.load %arg3[%c0_4, %c0_5] : memref<8x1xf32, #tpu.memory_space<vmem>>, vector<8x1xf32>
    %5 = vector.broadcast %4 : vector<8x1xf32> to vector<8x256xf32>
    %6 = arith.addf %3, %5 : vector<8x256xf32>
    %c255_i32 = arith.constant 255 : i32
    %7 = tpu.dynamic_rotate %0 by %c255_i32 dim 1 : vector<4x256xf32>, i32 -> vector<4x256xf32>
    %c1 = arith.constant 1 : index
    %c0_6 = arith.constant 0 : index
    %c0_7 = arith.constant 0 : index
    %8 = vector.load %arg2[%c1, %c0_6, %c0_7] : memref<9x8x4xf32, #tpu.memory_space<vmem>>, vector<1x8x4xf32>
    %9 = vector.shape_cast %8 : vector<1x8x4xf32> to vector<8x4xf32>
    %cst_8 = arith.constant dense<0.000000e+00> : vector<8x256xf32>
    %10 = tpu.matmul %9, %7, %cst_8 {dimension_numbers = #tpu.dot_dimension_numbers<[1], [0], [0], [1], [0, 0, 1, 1], [], []>} : vector<8x4xf32>, vector<4x256xf32>, vector<8x256xf32> -> vector<8x256xf32>
    %11 = arith.addf %6, %10 : vector<8x256xf32>
    %c254_i32 = arith.constant 254 : i32
    %12 = tpu.dynamic_rotate %0 by %c254_i32 dim 1 : vector<4x256xf32>, i32 -> vector<4x256xf32>
    %c2 = arith.constant 2 : index
    %c0_9 = arith.constant 0 : index
    %c0_10 = arith.constant 0 : index
    %13 = vector.load %arg2[%c2, %c0_9, %c0_10] : memref<9x8x4xf32, #tpu.memory_space<vmem>>, vector<1x8x4xf32>
    %14 = vector.shape_cast %13 : vector<1x8x4xf32> to vector<8x4xf32>
    %cst_11 = arith.constant dense<0.000000e+00> : vector<8x256xf32>
    %15 = tpu.matmul %14, %12, %cst_11 {dimension_numbers = #tpu.dot_dimension_numbers<[1], [0], [0], [1], [0, 0, 1, 1], [], []>} : vector<8x4xf32>, vector<4x256xf32>, vector<8x256xf32> -> vector<8x256xf32>
    %16 = arith.addf %11, %15 : vector<8x256xf32>
    %c253_i32 = arith.constant 253 : i32
    %17 = tpu.dynamic_rotate %0 by %c253_i32 dim 1 : vector<4x256xf32>, i32 -> vector<4x256xf32>
    %c3 = arith.constant 3 : index
    %c0_12 = arith.constant 0 : index
    %c0_13 = arith.constant 0 : index
    %18 = vector.load %arg2[%c3, %c0_12, %c0_13] : memref<9x8x4xf32, #tpu.memory_space<vmem>>, vector<1x8x4xf32>
    %19 = vector.shape_cast %18 : vector<1x8x4xf32> to vector<8x4xf32>
    %cst_14 = arith.constant dense<0.000000e+00> : vector<8x256xf32>
    %20 = tpu.matmul %19, %17, %cst_14 {dimension_numbers = #tpu.dot_dimension_numbers<[1], [0], [0], [1], [0, 0, 1, 1], [], []>} : vector<8x4xf32>, vector<4x256xf32>, vector<8x256xf32> -> vector<8x256xf32>
    %21 = arith.addf %16, %20 : vector<8x256xf32>
    %c252_i32 = arith.constant 252 : i32
    %22 = tpu.dynamic_rotate %0 by %c252_i32 dim 1 : vector<4x256xf32>, i32 -> vector<4x256xf32>
    %c4 = arith.constant 4 : index
    %c0_15 = arith.constant 0 : index
    %c0_16 = arith.constant 0 : index
    %23 = vector.load %arg2[%c4, %c0_15, %c0_16] : memref<9x8x4xf32, #tpu.memory_space<vmem>>, vector<1x8x4xf32>
    %24 = vector.shape_cast %23 : vector<1x8x4xf32> to vector<8x4xf32>
    %cst_17 = arith.constant dense<0.000000e+00> : vector<8x256xf32>
    %25 = tpu.matmul %24, %22, %cst_17 {dimension_numbers = #tpu.dot_dimension_numbers<[1], [0], [0], [1], [0, 0, 1, 1], [], []>} : vector<8x4xf32>, vector<4x256xf32>, vector<8x256xf32> -> vector<8x256xf32>
    %26 = arith.addf %21, %25 : vector<8x256xf32>
    %c251_i32 = arith.constant 251 : i32
    %27 = tpu.dynamic_rotate %0 by %c251_i32 dim 1 : vector<4x256xf32>, i32 -> vector<4x256xf32>
    %c5 = arith.constant 5 : index
    %c0_18 = arith.constant 0 : index
    %c0_19 = arith.constant 0 : index
    %28 = vector.load %arg2[%c5, %c0_18, %c0_19] : memref<9x8x4xf32, #tpu.memory_space<vmem>>, vector<1x8x4xf32>
    %29 = vector.shape_cast %28 : vector<1x8x4xf32> to vector<8x4xf32>
    %cst_20 = arith.constant dense<0.000000e+00> : vector<8x256xf32>
    %30 = tpu.matmul %29, %27, %cst_20 {dimension_numbers = #tpu.dot_dimension_numbers<[1], [0], [0], [1], [0, 0, 1, 1], [], []>} : vector<8x4xf32>, vector<4x256xf32>, vector<8x256xf32> -> vector<8x256xf32>
    %31 = arith.addf %26, %30 : vector<8x256xf32>
    %c250_i32 = arith.constant 250 : i32
    %32 = tpu.dynamic_rotate %0 by %c250_i32 dim 1 : vector<4x256xf32>, i32 -> vector<4x256xf32>
    %c6 = arith.constant 6 : index
    %c0_21 = arith.constant 0 : index
    %c0_22 = arith.constant 0 : index
    %33 = vector.load %arg2[%c6, %c0_21, %c0_22] : memref<9x8x4xf32, #tpu.memory_space<vmem>>, vector<1x8x4xf32>
    %34 = vector.shape_cast %33 : vector<1x8x4xf32> to vector<8x4xf32>
    %cst_23 = arith.constant dense<0.000000e+00> : vector<8x256xf32>
    %35 = tpu.matmul %34, %32, %cst_23 {dimension_numbers = #tpu.dot_dimension_numbers<[1], [0], [0], [1], [0, 0, 1, 1], [], []>} : vector<8x4xf32>, vector<4x256xf32>, vector<8x256xf32> -> vector<8x256xf32>
    %36 = arith.addf %31, %35 : vector<8x256xf32>
    %c249_i32 = arith.constant 249 : i32
    %37 = tpu.dynamic_rotate %0 by %c249_i32 dim 1 : vector<4x256xf32>, i32 -> vector<4x256xf32>
    %c7 = arith.constant 7 : index
    %c0_24 = arith.constant 0 : index
    %c0_25 = arith.constant 0 : index
    %38 = vector.load %arg2[%c7, %c0_24, %c0_25] : memref<9x8x4xf32, #tpu.memory_space<vmem>>, vector<1x8x4xf32>
    %39 = vector.shape_cast %38 : vector<1x8x4xf32> to vector<8x4xf32>
    %cst_26 = arith.constant dense<0.000000e+00> : vector<8x256xf32>
    %40 = tpu.matmul %39, %37, %cst_26 {dimension_numbers = #tpu.dot_dimension_numbers<[1], [0], [0], [1], [0, 0, 1, 1], [], []>} : vector<8x4xf32>, vector<4x256xf32>, vector<8x256xf32> -> vector<8x256xf32>
    %41 = arith.addf %36, %40 : vector<8x256xf32>
    %c248_i32 = arith.constant 248 : i32
    %42 = tpu.dynamic_rotate %0 by %c248_i32 dim 1 : vector<4x256xf32>, i32 -> vector<4x256xf32>
    %c8 = arith.constant 8 : index
    %c0_27 = arith.constant 0 : index
    %c0_28 = arith.constant 0 : index
    %43 = vector.load %arg2[%c8, %c0_27, %c0_28] : memref<9x8x4xf32, #tpu.memory_space<vmem>>, vector<1x8x4xf32>
    %44 = vector.shape_cast %43 : vector<1x8x4xf32> to vector<8x4xf32>
    %cst_29 = arith.constant dense<0.000000e+00> : vector<8x256xf32>
    %45 = tpu.matmul %44, %42, %cst_29 {dimension_numbers = #tpu.dot_dimension_numbers<[1], [0], [0], [1], [0, 0, 1, 1], [], []>} : vector<8x4xf32>, vector<4x256xf32>, vector<8x256xf32> -> vector<8x256xf32>
    %46 = arith.addf %41, %45 : vector<8x256xf32>
    %cst_30 = arith.constant 2.000000e+01 : f32
    %47 = vector.broadcast %cst_30 : f32 to vector<8x256xf32>
    %48 = arith.minimumf %46, %47 : vector<8x256xf32>
    %49 = math.exp %48 : vector<8x256xf32>
    %cst_31 = arith.constant 2.000000e+00 : f32
    %50 = vector.broadcast %cst_31 : f32 to vector<8x256xf32>
    %51 = arith.addf %49, %50 : vector<8x256xf32>
    %52 = arith.mulf %49, %51 : vector<8x256xf32>
    %cst_32 = arith.constant 2.000000e+00 : f32
    %53 = vector.broadcast %cst_32 : f32 to vector<8x256xf32>
    %54 = arith.addf %52, %53 : vector<8x256xf32>
    %55 = arith.divf %52, %54 : vector<8x256xf32>
    %56 = arith.mulf %46, %55 : vector<8x256xf32>
    %cst_33 = arith.constant 2.000000e+01 : f32
    %57 = vector.broadcast %cst_33 : f32 to vector<8x256xf32>
    %58 = arith.cmpf ogt, %46, %57 : vector<8x256xf32>
    %59 = arith.select %58, %46, %56 : vector<8x256xi1>, vector<8x256xf32>
    %c0_34 = arith.constant 0 : index
    %c0_35 = arith.constant 0 : index
    %60 = vector.load %arg4[%c0_34, %c0_35] : memref<8x1xf32, #tpu.memory_space<vmem>>, vector<8x1xf32>
    %61 = vector.broadcast %60 : vector<8x1xf32> to vector<8x256xf32>
    %62 = arith.mulf %59, %61 : vector<8x256xf32>
    %c0_36 = arith.constant 0 : index
    %c0_37 = arith.constant 0 : index
    %63 = vector.load %arg5[%c0_36, %c0_37] : memref<8x1xf32, #tpu.memory_space<vmem>>, vector<8x1xf32>
    %64 = vector.broadcast %63 : vector<8x1xf32> to vector<8x256xf32>
    %65 = arith.addf %62, %64 : vector<8x256xf32>
    %c0_38 = arith.constant 0 : index
    %c0_39 = arith.constant 0 : index
    %66 = vector.load %arg6[%c0_38, %c0_39] : memref<8x256xf32, #tpu.memory_space<vmem>>, vector<8x256xf32>
    tpu.vector_store %arg6[%c0_38, %c0_39], %65 {strides = array<i32>} : memref<8x256xf32, #tpu.memory_space<vmem>>, vector<8x256xf32>,
    return
  }
  func.func @transform_0(%arg0: i32) -> (i32, i32) {
    %c0_i32 = arith.constant 0 : i32
    %c0_i32_0 = arith.constant 0 : i32
    return %c0_i32, %arg0 : i32, i32
  }
  func.func @transform_1(%arg0: i32) -> (i32, i32, i32) {
    %c0_i32 = arith.constant 0 : i32
    %c0_i32_0 = arith.constant 0 : i32
    %c0_i32_1 = arith.constant 0 : i32
    %c0_i32_2 = arith.constant 0 : i32
    return %c0_i32, %c0_i32_0, %c0_i32_1 : i32, i32, i32
  }
  func.func @transform_2(%arg0: i32) -> (i32, i32) {
    %c0_i32 = arith.constant 0 : i32
    %c0_i32_0 = arith.constant 0 : i32
    %c0_i32_1 = arith.constant 0 : i32
    return %c0_i32, %c0_i32_0 : i32, i32
  }
  func.func @transform_3(%arg0: i32) -> (i32, i32) {
    %c0_i32 = arith.constant 0 : i32
    %c0_i32_0 = arith.constant 0 : i32
    %c0_i32_1 = arith.constant 0 : i32
    return %c0_i32, %c0_i32_0 : i32, i32
  }
  func.func @transform_4(%arg0: i32) -> (i32, i32) {
    %c0_i32 = arith.constant 0 : i32
    %c0_i32_0 = arith.constant 0 : i32
    %c0_i32_1 = arith.constant 0 : i32
    return %c0_i32, %c0_i32_0 : i32, i32
  }
  func.func @transform_5(%arg0: i32) -> (i32, i32) {
    %c0_i32 = arith.constant 0 : i32
    %c0_i32_0 = arith.constant 0 : i32
    return %c0_i32, %arg0 : i32, i32
  }
}

</mosaic_0001>

<bundles_post_ra>
// kernel: tpu_custom_call.1
= control target key start
LH: loop header
LB: loop body
LE: loop exit
PB: predicated region body
PF: predicated region fallthrough
CT: control target
= control target key end

     0   :  { %10 = vsyncpa [#allocation3], 0  ;;  %s1540_s0 = inlined_call_operand.vmem [shape: f32[4,1024], index: 0, kind: input, shape index: {}]   ;;  %s1541_s1 = inlined_call_operand.vmem [shape: f32[9,8,4], index: 1, kind: input, shape index: {}]   ;;  %s1542_s2 = inlined_call_operand.vmem [shape: f32[8,1], index: 2, kind: input, shape index: {}]   ;;  %s1543_s3 = inlined_call_operand.vmem [shape: f32[8,1], index: 3, kind: input, shape index: {}]   ;;  %s1544_s4 = inlined_call_operand.vmem [shape: f32[8,1], index: 4, kind: input, shape index: {}]   ;;  %s1545_s5 = inlined_call_operand.hbm [shape: f32[8,1024], index: 5, kind: output, shape index: {}]  }
   0x1   :  { %12 = vsyncpa [#allocation3 + $0x1], 0  ;;  %s1372_s18 = smov 0   ;;  %s1374_s19 = smov 0  }
   0x2   :  { %s1376_s20 = smov 0   ;;  %s1378_s21 = smov 0  }
   0x3 LB: > { %s1393_s22 = sadd.s32 4294967295, %s1329_s21   ;;  %s1161_s23 = sadd.s32 4294967294, %s1329_s21   ;;  %s1329_s21 = sphi %s1378_s21, %s1551_s21   ;;  %s1325_s20 = sphi %s1376_s20, %s1550_s20   ;;  %s1321_s19 = sphi %s1374_s19, %s1549_s19   ;;  %s1317_s18 = sphi %s1372_s18, %s1548_s18  }
   0x4   : > { %s1397_s24 = sadd.s32 1, %s1329_s21   ;;  %s135_s25 = sadd.s32 1, %s1325_s20 }
   0x5   : > { %s132_s26 = ssub.s32 %s1329_s21, %s1397_s24  ;;  %p145_p0 = scmp.ne.s32.totalorder %s1325_s20, %s1321_s19 }
   0x6   : > { %p133_p1 = scmp.eq.s32.totalorder %s132_s26, 0  ;;  %p146_p2 = scmp.eq.s32.totalorder %s1393_s22, 3 }
   0x7   : > { %p151_p3 = scmp.ne.s32.totalorder %s1321_s19, %s1317_s18  ;;  %p152_p4 = scmp.eq.s32.totalorder %s1161_s23, 3 }
   0x8   : > { %s1408_s27 = scalar_select %p133_p1, %s1325_s20, %s135_s25  }
   0x9   : > { %p1410_p5 = por %p146_p2, %p145_p0  ;;  %p1414_p6 = por %p152_p4, %p151_p3 }
   0xa   : > { %p1164_p7 = scmp.ge.s32.totalorder %s1329_s21, 1  ;;  %p191_p8 = scmp.lt.s32.totalorder %s1329_s21, 5 }
   0xc   : > { %p192_p9 = pnand %p1164_p7, %p191_p8 }
   0xd   : > { %s1166_s30 = sshll.u32 (!%p192_p9), %s1393_s22, 1  ;;  %s1332_s10 = smov (!%p192_p9), 126  }
   0xe   : > { %195 = sbr.rel (%p192_p9) target bundleno = 426 (0x1aa), region = 40  ;;  %p220_p10 = scmp.lt.s32.totalorder (!%p192_p9), %s1166_s30, 7 }
   0xf   : > { %s1333_s11 = smov (!%p192_p9), 127   ;;  %s1334_s14 = smov (!%p192_p9), 125  }
  0x10   : > { %s1335_s15 = smov (!%p192_p9), 124   ;;  %s1336_s16 = smov (!%p192_p9), 123  }
  0x11   : > { %s1338_s17 = smov (!%p192_p9), 122   ;;  %s1339_s23 = smov (!%p192_p9), 121  }
  0x12   : > { %s1340_s25 = smov (!%p192_p9), 120   ;;  %s1208_s12 = sshll.u32 (!%p192_p9), %s1393_s22, 8 }
  0x13   : > { %v1331_v0 = vmov 0.0   ;;  %s1553_s30 = smov (!%p220_p10, %s1166_s30), 7  ;;  %vm240_vm0 = vcmask 1043456   ;;  %v227_v3 = vld [vmem:[%s1541_s1] sm:$0xff]  ;;  %vm236_vm1 = vcmask 31744   ;;  %v1337_v4 = vmov 0  }
  0x14   : > { %309 = vmatprep.mubr.f32.mxu0 %v1331_v0  ;;  %401 = vmatprep.mubr.f32.mxu1 %v1331_v0  ;;  %s1167_s6 = sshll.u32 %s1553_s30, 2  ;;  %v228_v5 = vld [vmem:[%s1542_s2] sm:$0xff]  ;;  %v321_v8 = vlaneseq  ;;  %v1175_v16 = vld [vmem:[%s1541_s1 + $0x10] sm:$0xff]  ;;  %v1171_v21 = vld [vmem:[%s1541_s1 + $0x8] sm:$0xff]  ;;  %s1341_s26 = smov [#allocation2]  }
  0x15   : > { %s223_s9 = scalar_lea.vmem %s1540_s0, %s1167_s6  ;;  %1258 = vset.pattern.permute.xlu0 %v1337_v4  ;;  %1259 = vset.pattern.permute.xlu1 %v1337_v4  ;;  %v1069_v6 = vld [vmem:[%s1543_s3] sm:$0xff]  ;;  %v1179_v28 = vld [vmem:[%s1541_s1 + $0x18] sm:$0xff]  ;;  %v1187_v34 = vld [vmem:[%s1541_s1 + $0x28] sm:$0xff]  ;;  %s1273_s22 = sshll.u32 %s1341_s26, 4  ;;  %s1274_s22 = int_to_ptr.vmem [resolvable:$false] %s1273_s22 }
  0x16   : > { %v226_v1 = vld [vmem:[%s223_s9] sm:$0xff]  ;;  %v1442_v9 = vand.u32 127, %v321_v8  ;;  %v1191_v39 = vld [vmem:[%s1541_s1 + $0x30] sm:$0xff]  ;;  %v1195_v44 = vld [vmem:[%s1541_s1 + $0x38] sm:$0xff]  ;;  %s1275_s30 = scalar_lea.vmem %s1274_s22, 512 }
  0x17   : > { %410 = vrot.lane.b32.xlu1 %v226_v1, %s1332_s10  ;;  %317 = vrot.lane.b32.xlu0 %v226_v1, %s1333_s11  ;;  %v235_v2 = vcombine.high %v226_v1, %v226_v1  ;;  %v1077_v7 = vld [vmem:[%s1544_s4] sm:$0xff] }
  0x18   : > { %vm414_vm2 = vcmp.lt.s32.totalorder %v1442_v9, 126  ;;  %vm323_vm3 = vcmp.lt.s32.totalorder %v1442_v9, 127  ;;  %vm505_vm4 = vcmp.lt.s32.totalorder %v1442_v9, 125  ;;  %vm596_vm5 = vcmp.lt.s32.totalorder %v1442_v9, 124  ;;  %v1183_v29 = vld [vmem:[%s1541_s1 + $0x20] sm:$0xff] }
  0x19   : > { %1168 = vmatprep.subr.msk.mxu0 %vm240_vm0, %v235_v2  ;;  %vm687_vm6 = vcmp.lt.s32.totalorder %v1442_v9, 123  ;;  %vm778_vm7 = vcmp.lt.s32.totalorder %v1442_v9, 122  ;;  %vm869_vm8 = vcmp.lt.s32.totalorder %v1442_v9, 121  ;;  %vm960_vm9 = vcmp.lt.s32.totalorder %v1442_v9, 120  ;;  %v1199_v49 = vld [vmem:[%s1541_s1 + $0x40] sm:$0xff] }
  0x1a   : > { %1169 = vmatpush1.msk.msra.mxu0 %vm240_vm0, %v226_v1 }
  0x1b   : > { %501 = vrot.lane.b32.xlu0 %v226_v1, %s1334_s14  ;;  %412 = vrot.lane.b32.xlu1 %v235_v2, %s1332_s10  ;;  %s216_s10 = sand.u32 1, %s1321_s19  }
  0x1c   : > { %1170 = vmatmul.mubr.msk.f32.vlgmr.msra.gmra.mxu0 %vm236_vm1, %v227_v3 }
  0x1d   : > { %492 = vmatprep.mubr.f32.mxu0 %v1331_v0 }
  0x1f   : > { %503 = vrot.lane.b32.xlu1 %v235_v2, %s1334_s14  ;;  %319 = vrot.lane.b32.xlu0 %v235_v2, %s1333_s11  ;;  %s1165_s11 = sshll.u32 %s216_s10, 4 }
  0x20   : > { %s218_s13 = scalar_lea.vmem [#allocation2], %s1165_s11 }
  0x21   : > { %s1102_s14 = sshll.u32 %s218_s13, 4  ;;  %s1103_s14 = int_to_ptr.vmem [resolvable:$true] %s1102_s14 }
  0x22   : > { %p1276_p0 = scmp.lt.s32.totalorder %s1103_s14, %s1274_s22 }
  0x23   : > { %594 = vrot.lane.b32.xlu1 %v235_v2, %s1335_s15  ;;  %592 = vrot.lane.b32.xlu0 %v226_v1, %s1335_s15 }
  0x27   : > { %685 = vrot.lane.b32.xlu1 %v235_v2, %s1336_s16  ;;  %683 = vrot.lane.b32.xlu0 %v226_v1, %s1336_s16 }
  0x2b   : > { %776 = vrot.lane.b32.xlu1 %v235_v2, %s1338_s17  ;;  %774 = vrot.lane.b32.xlu0 %v226_v1, %s1338_s17  ;;  %s1100_s17 = scalar_lea.hbm %s1545_s5, %s1208_s12 }
  0x2f   : > { %867 = vrot.lane.b32.xlu1 %v235_v2, %s1339_s23  ;;  %865 = vrot.lane.b32.xlu0 %v226_v1, %s1339_s23  ;;  %s1088_s23 = scalar_lea.sflag [#allocation3], %s216_s10 }
  0x33   : > { %958 = vrot.lane.b32.xlu1 %v235_v2, %s1340_s25  ;;  %956 = vrot.lane.b32.xlu0 %v226_v1, %s1340_s25  ;;  %s1269_s25 = scalar_lea.vmem %s1103_s14, 256 }
  0x34   : > { %p1270_p11 = scmp.ne.s32.totalorder %s1103_s14, %s1269_s25  ;;  %p1277_p1 = scmp.lt.s32.totalorder %s1275_s30, %s1269_s25 }
  0x36   : > { %p1271_p12 = pnand %p1270_p11, %p1410_p5  ;;  %p1278_p2 = por %p1277_p1, %p1276_p0 }
  0x37   : > { %231 = vperm.xlu0 %1258, %v228_v5   ;;  %1072 = vperm.xlu1 %1259, %v1069_v6  }
  0x38   : > { %p1272_p13 = pneg %p1271_p12 }
  0x3a   : > { %p1279_p3 = pnand %p1278_p2, %p1272_p13 }
  0x3b   : > { %1080 = vperm.xlu1 %1259, %v1077_v7  }
  0x89   : > { %v411_v10 = vpop.permute.xlu1 %410  ;;  %v318_v11 = vpop.permute.xlu0 %317 }
  0x8d   : > { %v502_v12 = vpop.permute.xlu0 %501  ;;  %v413_v13 = vpop.permute.xlu1 %412 }
  0x8e   : > { %v415_v14 = vsel %vm414_vm2, %v411_v10, %v413_v13  ;;  %v416_v15 = vsel %vm414_vm2, %v413_v13, %v411_v10 }
  0x8f   : > { %1176 = vmatprep.subr.msk.mxu0 %vm240_vm0, %v416_v15 }
  0x90   : > { %1177 = vmatpush1.msk.msra.mxu0 %vm240_vm0, %v415_v14 }
  0x91   : > { %v504_v17 = vpop.permute.xlu1 %503  ;;  %v320_v18 = vpop.permute.xlu0 %319  ;;  %1178 = vmatmul.mubr.msk.f32.vlgmr.msra.gmra.mxu0 %vm236_vm1, %v1175_v16 }
  0x92   : > { %v325_v19 = vsel %vm323_vm3, %v320_v18, %v318_v11  ;;  %v324_v20 = vsel %vm323_vm3, %v318_v11, %v320_v18  ;;  %674 = vmatprep.mubr.f32.mxu0 %v1331_v0  ;;  %v507_v22 = vsel %vm505_vm4, %v504_v17, %v502_v12  ;;  %v506_v23 = vsel %vm505_vm4, %v502_v12, %v504_v17 }
  0x93   : > { %1172 = vmatprep.subr.msk.mxu1 %vm240_vm0, %v325_v19 }
  0x94   : > { %1173 = vmatpush1.msk.msra.mxu1 %vm240_vm0, %v324_v20 }
  0x95   : > { %v595_v24 = vpop.permute.xlu1 %594  ;;  %1180 = vmatprep.subr.msk.mxu1 %vm240_vm0, %v507_v22  ;;  %v593_v25 = vpop.permute.xlu0 %592  ;;  %1174 = vmatmul.mubr.msk.f32.vlgmr.msra.gmra.mxu1 %vm236_vm1, %v1171_v21 }
  0x96   : > { %v597_v26 = vsel %vm596_vm5, %v593_v25, %v595_v24  ;;  %v598_v27 = vsel %vm596_vm5, %v595_v24, %v593_v25  ;;  %1181 = vmatpush1.msk.msra.mxu1 %vm240_vm0, %v506_v23  ;;  %583 = vmatprep.mubr.f32.mxu1 %v1331_v0 }
  0x97   : > { %1184 = vmatprep.subr.msk.mxu0 %vm240_vm0, %v598_v27 }
  0x98   : > { %1185 = vmatpush1.msk.msra.mxu0 %vm240_vm0, %v597_v26 }
  0x99   : > { %v686_v30 = vpop.permute.xlu1 %685  ;;  %v684_v31 = vpop.permute.xlu0 %683  ;;  %1182 = vmatmul.mubr.msk.f32.vlgmr.msra.gmra.mxu1 %vm236_vm1, %v1179_v28  ;;  %1186 = vmatmul.mubr.msk.f32.vlgmr.msra.gmra.mxu0 %vm236_vm1, %v1183_v29 }
  0x9a   : > { %v688_v32 = vsel %vm687_vm6, %v684_v31, %v686_v30  ;;  %v689_v33 = vsel %vm687_vm6, %v686_v30, %v684_v31  ;;  %765 = vmatprep.mubr.f32.mxu1 %v1331_v0  ;;  %856 = vmatprep.mubr.f32.mxu0 %v1331_v0 }
  0x9b   : > { %1188 = vmatprep.subr.msk.mxu1 %vm240_vm0, %v689_v33 }
  0x9c   : > { %1189 = vmatpush1.msk.msra.mxu1 %vm240_vm0, %v688_v32 }
  0x9d   : > { %v777_v35 = vpop.permute.xlu1 %776  ;;  %v775_v36 = vpop.permute.xlu0 %774  ;;  %1190 = vmatmul.mubr.msk.f32.vlgmr.msra.gmra.mxu1 %vm236_vm1, %v1187_v34 }
  0x9e   : > { %v779_v37 = vsel %vm778_vm7, %v775_v36, %v777_v35  ;;  %v780_v38 = vsel %vm778_vm7, %v777_v35, %v775_v36  ;;  %947 = vmatprep.mubr.f32.mxu1 %v1331_v0 }
  0x9f   : > { %1192 = vmatprep.subr.msk.mxu0 %vm240_vm0, %v780_v38 }
  0xa0   : > { %1193 = vmatpush1.msk.msra.mxu0 %vm240_vm0, %v779_v37 }
  0xa1   : > { %v868_v40 = vpop.permute.xlu1 %867  ;;  %v866_v41 = vpop.permute.xlu0 %865  ;;  %1194 = vmatmul.mubr.msk.f32.vlgmr.msra.gmra.mxu0 %vm236_vm1, %v1191_v39 }
  0xa2   : > { %v870_v42 = vsel %vm869_vm8, %v866_v41, %v868_v40  ;;  %v871_v43 = vsel %vm869_vm8, %v868_v40, %v866_v41  ;;  %1038 = vmatprep.mubr.f32.mxu0 %v1331_v0 }
  0xa3   : > { %1196 = vmatprep.subr.msk.mxu1 %vm240_vm0, %v871_v43 }
  0xa4   : > { %1197 = vmatpush1.msk.msra.mxu1 %vm240_vm0, %v870_v42 }
  0xa5   : > { %v959_v45 = vpop.permute.xlu1 %958  ;;  %v957_v46 = vpop.permute.xlu0 %956  ;;  %1198 = vmatmul.mubr.msk.f32.vlgmr.msra.gmra.mxu1 %vm236_vm1, %v1195_v44 }
  0xa6   : > { %v961_v47 = vsel %vm960_vm9, %v957_v46, %v959_v45  ;;  %v962_v48 = vsel %vm960_vm9, %v959_v45, %v957_v46 }
  0xa7   : > { %1200 = vmatprep.subr.msk.mxu0 %vm240_vm0, %v962_v48 }
  0xa8   : > { %1201 = vmatpush1.msk.msra.mxu0 %vm240_vm0, %v961_v47 }
  0xa9   : > { %1202 = vmatmul.mubr.msk.f32.vlgmr.msra.gmra.mxu0 %vm236_vm1, %v1199_v49 }
  0xb2   : > { %v232_v52 = vpop.permute.xlu0 %231  ;;  %v1073_v36 = vpop.permute.xlu1 %1072 }
  0xb6   : > { %v1081_v45 = vpop.permute.xlu1 %1080 }
  0xdc   : > { %v311_v50 = vpop.f32.mrf.mxu0 }
  0xdd   : > { %v312_v54 = vadd.f32 %v311_v50, %v232_v52 }
  0xde   : > { %v313_v51 = vpop.f32.mrf.mxu0 }
  0xdf   : > { %v314_v55 = vadd.f32 %v313_v51, %v232_v52 }
 0x151   : > { %v494_v53 = vpop.f32.mrf.mxu0 }
 0x153   : > { %v496_v57 = vpop.f32.mrf.mxu0 }
 0x155   : > { %v403_v56 = vpop.f32.mrf.mxu1 }
 0x156   : > { %v408_v58 = vadd.f32 %v403_v56, %v312_v54 }
 0x157   : > { %v405_v59 = vpop.f32.mrf.mxu1 }
 0x158   : > { %v409_v60 = vadd.f32 %v405_v59, %v314_v55  ;;  %v499_v61 = vadd.f32 %v494_v53, %v408_v58 }
 0x159   : > { %v585_v62 = vpop.f32.mrf.mxu1  ;;  %v676_v63 = vpop.f32.mrf.mxu0 }
 0x15a   : > { %v500_v0 = vadd.f32 %v496_v57, %v409_v60  ;;  %v590_v1 = vadd.f32 %v585_v62, %v499_v61 }
 0x15b   : > { %v587_v2 = vpop.f32.mrf.mxu1  ;;  %v678_v3 = vpop.f32.mrf.mxu0 }
 0x15c   : > { %v591_v4 = vadd.f32 %v587_v2, %v500_v0  ;;  %v681_v5 = vadd.f32 %v676_v63, %v590_v1 }
 0x15d   : > { %v767_v6 = vpop.f32.mrf.mxu1 }
 0x15e   : > { %v682_v7 = vadd.f32 %v678_v3, %v591_v4  ;;  %v772_v8 = vadd.f32 %v767_v6, %v681_v5 }
 0x15f   : > { %v769_v9 = vpop.f32.mrf.mxu1 }
 0x160   : > { %v773_v11 = vadd.f32 %v769_v9, %v682_v7 }
 0x161   : > { %v858_v10 = vpop.f32.mrf.mxu0 }
 0x162   : > { %v863_v12 = vadd.f32 %v858_v10, %v772_v8 }
 0x163   : > { %v860_v13 = vpop.f32.mrf.mxu0 }
 0x164   : > { %v864_v15 = vadd.f32 %v860_v13, %v773_v11 }
 0x165   : > { %v949_v14 = vpop.f32.mrf.mxu1 }
 0x166   : > { %v954_v16 = vadd.f32 %v949_v14, %v863_v12 }
 0x167   : > { %v951_v17 = vpop.f32.mrf.mxu1 }
 0x168   : > { %v955_v19 = vadd.f32 %v951_v17, %v864_v15 }
 0x169   : > { %v1040_v18 = vpop.f32.mrf.mxu0 }
 0x16a   : > { %v1045_v20 = vadd.f32 %v1040_v18, %v954_v16 }
 0x16b   : > { %v1042_v21 = vpop.f32.mrf.mxu0 }
 0x16c   : > { %v1047_v22 = vmin.f32 %v1045_v20, 20.0  ;;  %v1046_v23 = vadd.f32 %v1042_v21, %v955_v19  ;;  %vm1065_vm10 = vcmp.gt.f32.partialorder %v1045_v20, 20.0 }
 0x16e   : > { %v1049_v24 = vmul.f32 1.442695, %v1047_v22  ;;  %v1048_v25 = vmin.f32 %v1046_v23, 20.0  ;;  %vm1066_vm11 = vcmp.gt.f32.partialorder %v1046_v23, 20.0 }
 0x170   : > { %1261 = vpow2.f32 %v1049_v24  ;;  %v1051_v26 = vmul.f32 1.442695, %v1048_v25 }
 0x172   : > { %1263 = vpow2.f32 %v1051_v26 }
 0x17d   : > { %v1262_v27 = vpop.eup %1261 }
 0x17e   : > { %v1053_v28 = vadd.f32 2.0, %v1262_v27 }
 0x17f   : > { %v1264_v29 = vpop.eup %1263 }
 0x180   : > { %v1054_v30 = vadd.f32 2.0, %v1264_v29  ;;  %v1055_v31 = vmul.f32 %v1262_v27, %v1053_v28 }
 0x182   : > { %v1056_v32 = vmul.f32 %v1264_v29, %v1054_v30  ;;  %v1057_v33 = vadd.f32 2.0, %v1055_v31 }
 0x184   : > { %v1058_v34 = vadd.f32 2.0, %v1056_v32  ;;  %1265 = vrcp.f32 %v1057_v33 }
 0x186   : > { %1267 = vrcp.f32 %v1058_v34 }
 0x191   : > { %v1266_v35 = vpop.eup %1265 }
 0x192   : > { %v1060_v37 = vmul.f32 %v1266_v35, %v1055_v31 }
 0x193   : > { %v1268_v38 = vpop.eup %1267 }
 0x194   : > { %v1062_v39 = vmul.f32 %v1268_v38, %v1056_v32  ;;  %v1063_v40 = vmul.f32 %v1060_v37, %v1045_v20 }
 0x196   : > { %v1064_v41 = vmul.f32 %v1062_v39, %v1046_v23  ;;  %v1067_v42 = vsel %vm1065_vm10, %v1045_v20, %v1063_v40 }
 0x197   : > { %v1075_v43 = vmul.f32 %v1073_v36, %v1067_v42 }
 0x198   : > { %v1068_v44 = vsel %vm1066_vm11, %v1046_v23, %v1064_v41 }
 0x199   : > { %v1076_v46 = vmul.f32 %v1073_v36, %v1068_v44  ;;  %v1083_v47 = vadd.f32 %v1081_v45, %v1075_v43 }
 0x19b   : > { %v1084_v48 = vadd.f32 %v1081_v45, %v1076_v46  ;;  %1085 = vst [vmem:[%s218_s13] sm:$0xff] %v1083_v47 }
 0x19d   : > { %1086 = vst [vmem:[%s218_s13 + $0x8] sm:$0xff] %v1084_v48 }
 0x19e   : > { %1282 = shalt.err (!%p1279_p3)
}
 0x19f   : > { %s1283_s6 = scalar_lea.hbm %s1100_s17, 256  ;;  %s1287_s9 = scalar_lea.hbm %s1545_s5, 1024 }
 0x1a0   : > { %p1284_p4 = scmp.ne.s32.totalorder %s1100_s17, %s1283_s6  ;;  %p1288_p9 = scmp.lt.s32.totalorder %s1100_s17, %s1545_s5 }
 0x1a1   : > { %p1289_p10 = scmp.lt.s32.totalorder %s1287_s9, %s1283_s6 }
 0x1a2   : > { %p1285_p7 = pnand %p1284_p4, %p1410_p5 }
 0x1a3   : > { %p1290_p11 = por %p1289_p10, %p1288_p9 }
 0x1a4   : > { %p1286_p8 = pneg %p1285_p7 }
 0x1a6   : > { %p1291_p12 = pnand %p1290_p11, %p1286_p8 }
 0x1a8   : > { %1294 = shalt.err (!%p1291_p12)
}
 0x1a9   : > { %1209 = dma.vmem_to_hbm [thread:$0]  (%p1410_p5), %s1103_s14, 256, %s1100_s17, %s1088_s23  }
 0x1aa PF: > { %p1215_p13 = scmp.ge.s32.totalorder %s1329_s21, 2  ;;  %s1114_s12 = sand.u32 1, %s1317_s18  }
 0x1ab   : > { %s1115_s13 = scalar_lea.sflag [#allocation3], %s1114_s12 }
 0x1ac   : > { %p1212_p0 = pnand %p1215_p13, %p1414_p6 }
 0x1ae   : > { %p1213_p1 = pneg %p1212_p0 }
 0x1b0   : > { %1312 = dma.done.wait (%p1213_p1), %s1115_s13, 256  }
 0x1b1   : > { %1314 = vsyncadd (%p1213_p1), %s1115_s13, 4294967040  ;;  %p15_p2 = scmp.ge.s32.totalorder %s1397_s24, 6   ;;  %s1548_s18 = smov %s1321_s19 }
 0x1b2   : > { %s1549_s19 = smov %s1325_s20  ;;  %s1550_s20 = smov %s1408_s27 }
 0x1b3   : > { %s1551_s21 = smov %s1397_s24  ;;  %17 = sbr.rel (!%p15_p2) target bundleno = 3 (0x3), region = 83 }
 0x1b8   :  { %1120 = vsyncpa [#allocation3], 1 }
 0x1b9   :  { %1122 = vsyncpa [#allocation3 + $0x1], 1 }

</bundles_post_ra>
